<compile_context>
chip_gen: v5e
topology: v5e:2x2
jax: 0.10.0
libtpu: 0.0.40
codegen_flags: <defaults>
</compile_context>

<pallas_src>
import functools

import jax
import jax.numpy as jnp
from jax.experimental import pallas as pl
from jax.experimental.pallas import tpu as pltpu

# Packed layout constants (demo-sized nets; see asserts in pack_deeponet_params).
D_PAD = 128            # padded width of branch activations (lanes)
HALF = D_PAD // 2      # branch1 occupies cols [0, HALF), branch2 cols [HALF, ...)
ONE_COL = D_PAD - 1    # lane/row carrying a constant 1.0 (folds the biases)

TILE_B_CAP = 2048                      # max batch-tile rows (multiple of 16)
VMEM_STEP_BUDGET = 16 * 1024 * 1024    # per-step double-buffered in+out bytes


def _round_up(v, m):
    return (v + m - 1) // m * m


# ---------------------------------------------------------------------------
# Kernel
# ---------------------------------------------------------------------------
def _deeponet_kernel(l_branch, branch_ref, trunk_ref, wb_ref, out_ref):
    """One batch tile of the DeepONet forward.

    branch_ref: [TILE_B, D_PAD]            bf16  fused branch input (+ ones lane)
    trunk_ref : [D_PAD, N_PAD]             bf16  precomputed trunk^T (rows >= p are 0)
    wb_ref    : [l_branch, D_PAD, D_PAD]   bf16  block-diag branch weights (biases folded)
    out_ref   : [TILE_B, N_PAD]            f32
    """
    f32 = jnp.float32
    bf16 = jnp.bfloat16

    # ---- fused branch1/branch2 MLP (block-diagonal weights) ----------------
    h = branch_ref[...]
    for i in range(l_branch):
        zb = jnp.dot(h, wb_ref[i], preferred_element_type=f32)
        if i < l_branch - 1:
            h = jnp.maximum(zb, 0.0).astype(bf16)    # ReLU in f32, bf16 for MXU
    branch_out = zb   # f32: cols [0,p) = branch1 out, [HALF,HALF+p) = branch2 out

    # Elementwise branch1*branch2 without lane slicing: rotate by HALF lanes
    # (a shift of 64 on a 128-lane axis is self-inverse) and multiply.  The
    # duplicated product block at cols [HALF,HALF+p) lands on all-zero trunk
    # rows (p < HALF is asserted at packing time), so the contraction is exact.
    prod = branch_out * pltpu.roll(branch_out, shift=HALF, axis=1)

    # ---- final contraction: lane-dense [TILE_B, N_PAD], no transpose -------
    out_ref[...] = jnp.dot(prod.astype(bf16), trunk_ref[...],
                           preferred_element_type=f32)


# ---------------------------------------------------------------------------
# One-time parameter packing (call ONCE after init; reuse the result)
# ---------------------------------------------------------------------------
def pack_deeponet_params(params):
    """Pack the two branch nets into one block-diagonal bf16 weight slab.

    NOTE: this is real XLA work (params are traced arrays, so this is NOT
    constant-folded under jit) — call it once and cache the result instead of
    re-packing inside the forward."""
    net1, net2, net_t = params
    l_branch = len(net1)
    assert l_branch >= 1 and len(net_t) >= 1
    assert len(net2) == l_branch, "branch nets must have the same depth"

    b1_widths = [net1[0][0].shape[0]] + [w.shape[1] for w, _ in net1]
    b2_widths = [net2[0][0].shape[0]] + [w.shape[1] for w, _ in net2]
    t_widths = [net_t[0][0].shape[0]] + [w.shape[1] for w, _ in net_t]
    p1, p2, pt = b1_widths[-1], b2_widths[-1], t_widths[-1]
    assert max(b1_widths) <= HALF, "branch1 widths (incl. 2N input) must be <= 64"
    assert max(b2_widths) < HALF, "branch2 widths must be < 64 (ones lane reserved)"
    assert max(t_widths) < D_PAD, "trunk widths must be < 128"
    assert p1 == p2 == pt and p1 < HALF, (
        "shared output width p must match across all nets and be < 64 "
        "(required for the roll-by-64 product trick to be exact)")

    wb = jnp.zeros((l_branch, D_PAD, D_PAD), jnp.float32)
    for i, ((w1, b1), (w2, b2)) in enumerate(zip(net1, net2)):
        in1, out1 = w1.shape
        in2, out2 = w2.shape
        wb = wb.at[i, 0:in1, 0:out1].set(w1)                      # branch1 block
        wb = wb.at[i, HALF:HALF + in2, HALF:HALF + out2].set(w2)  # branch2 block
        wb = wb.at[i, ONE_COL, 0:out1].set(b1)                    # biases via the
        wb = wb.at[i, ONE_COL, HALF:HALF + out2].set(b2)          # constant-1 lane
        if i < l_branch - 1:
            wb = wb.at[i, ONE_COL, ONE_COL].set(1.0)              # carry the 1.0
    return wb.astype(jnp.bfloat16), net_t


# ---------------------------------------------------------------------------
# Wrapper-side per-call work (cheap; depends on x)
# ---------------------------------------------------------------------------
def _pack_branch_input(x, b_pad):
    """Fused branch input [x0 | x1 | 0.. | x2 | 0.. | 1] as one bf16 slab."""
    B, N, _ = x.shape
    bi = jnp.zeros((b_pad, D_PAD), jnp.float32)
    bi = bi.at[:B, 0:N].set(x[..., 0])
    bi = bi.at[:B, N:2 * N].set(x[..., 1])
    bi = bi.at[:B, HALF:HALF + N].set(x[..., 2])
    bi = bi.at[:B, ONE_COL].set(1.0)
    return bi.astype(jnp.bfloat16)


def _trunk_transposed(x, net_t, n_pad):
    """Trunk MLP hoisted out of the kernel (depends only on x[0,:,3]).

    Computed in f32 (a handful of tiny matmuls), laid out transposed [p, N] and
    zero-padded to [D_PAD, n_pad] bf16 so the in-kernel final contraction is a
    plain lane-dense matmul with no transpose."""
    N = x.shape[1]
    t = x[0, :, 3][:, None]                     # [N, 1]
    for li, (w, b) in enumerate(net_t):
        t = jnp.dot(t, w) + b
        if li < len(net_t) - 1:
            t = jnp.maximum(t, 0.0)
    p = t.shape[1]
    tt = jnp.zeros((D_PAD, n_pad), jnp.float32)
    tt = tt.at[0:p, 0:N].set(t.T)               # rows >= p stay exactly zero
    return tt.astype(jnp.bfloat16)


# ---------------------------------------------------------------------------
# Public forward
# ---------------------------------------------------------------------------
def deeponet_forward(x, packed):
    """x: [B, N, 4] float32, packed = pack_deeponet_params(params) -> [B, N] f32."""
    wb, net_t = packed
    B, N, C = x.shape
    assert C == 4
    l_branch = wb.shape[0]

    n_pad = _round_up(N, 128)

    # Batch tile: as large as the per-step double-buffered VMEM budget allows
    # (bf16 input row + f32 output row), capped at TILE_B_CAP, multiple of 16
    # (native bf16 (16,128) sublane tile), and split >= 2 ways when B allows so
    # dimension_semantics=("parallel",) can shard tiles across v7x's two cores.
    per_row = 2 * (D_PAD * 2 + n_pad * 4)
    tile_cap = max(16, min(TILE_B_CAP, (VMEM_STEP_BUDGET // per_row) // 16 * 16))
    tile_b = min(tile_cap, max(16, _round_up(-(-B // 2), 16)))
    b_pad = _round_up(B, tile_b)

    branch_in = _pack_branch_input(x, b_pad)
    trunk_t = _trunk_transposed(x, net_t, n_pad)

    kernel = functools.partial(_deeponet_kernel, l_branch)
    out = pl.pallas_call(
        kernel,
        out_shape=jax.ShapeDtypeStruct((b_pad, n_pad), jnp.float32),
        grid_spec=pltpu.PrefetchScalarGridSpec(
            num_scalar_prefetch=0,
            grid=(b_pad // tile_b,),
            in_specs=[
                pl.BlockSpec((tile_b, D_PAD), lambda i: (i, 0)),     # batch tile
                pl.BlockSpec((D_PAD, n_pad), lambda i: (0, 0)),      # resident trunk^T
                pl.BlockSpec((l_branch, D_PAD, D_PAD), lambda i: (0, 0, 0)),  # resident W
            ],
            out_specs=pl.BlockSpec((tile_b, n_pad), lambda i: (i, 0)),
        ),
        compiler_params=pltpu.CompilerParams(
            dimension_semantics=("parallel",),
            vmem_limit_bytes=32 * 1024 * 1024),
    )(branch_in, trunk_t, wb)
    return out[:B, :N]


# ---------------------------------------------------------------------------
# Parameter init + reference
# ---------------------------------------------------------------------------
def init_deeponet_params(key, layers):
    """layers = [Layers_branch1, Layers_branch2, Layers_trunk].
    PyTorch nn.Linear-style U(-1/sqrt(fan_in), 1/sqrt(fan_in)) init.
    Returns per-net lists of (W[in, out], b[out]) float32 tuples."""
    params = []
    for sizes in layers:
        net = []
        for i in range(len(sizes) - 1):
            key, kw, kb = jax.random.split(key, 3)
            fan_in, fan_out = sizes[i], sizes[i + 1]
            bound = 1.0 / float(fan_in) ** 0.5
            w = jax.random.uniform(kw, (fan_in, fan_out), jnp.float32,
                                   -bound, bound)
            b = jax.random.uniform(kb, (fan_out,), jnp.float32, -bound, bound)
            net.append((w, b))
        params.append(net)
    return params


def deeponet_reference(x, params):
    """Per-layer implementation mirroring the PyTorch forward, with matmul
    operands cast to bf16 exactly where the kernel feeds the MXU (branch MLPs
    and the final contraction; trunk MLP stays in f32 as in the wrapper), so it
    validates the packing / block-diagonal fusion / roll-product mechanics at
    tight tolerance.  Relative to a pure-f32 forward, the bf16 operand rounding
    contributes ~1e-2-level relative deviation."""
    f32, bf16 = jnp.float32, jnp.bfloat16
    net1, net2, net_t = params

    def mlp_bf16(h, net):
        for li, (w, b) in enumerate(net):
            z = jnp.dot(h.astype(bf16), w.astype(bf16),
                        preferred_element_type=f32)
            z = z + b.astype(bf16).astype(f32)
            h = jnp.maximum(z, 0.0) if li < len(net) - 1 else z
        return h

    def mlp_f32(h, net):
        for li, (w, b) in enumerate(net):
            z = jnp.dot(h, w) + b
            h = jnp.maximum(z, 0.0) if li < len(net) - 1 else z
        return h

    b1_in = jnp.concatenate([x[..., 0], x[..., 1]], axis=1)
    b2_in = x[..., 2]
    t_in = x[0, :, 3][:, None]
    branch_out = mlp_bf16(b1_in, net1) * mlp_bf16(b2_in, net2)
    trunk_out = mlp_f32(t_in, net_t)
    return jnp.dot(branch_out.astype(bf16), trunk_out.T.astype(bf16),
                   preferred_element_type=f32)


if __name__ == "__main__":
    B, N, HIDDEN, P = 2, 16, 32, 32
    layers = [
        [2 * N, HIDDEN, HIDDEN, P],   # Layers_branch1 (input = 2N from the concat)
        [N, HIDDEN, HIDDEN, P],       # Layers_branch2
        [1, HIDDEN, HIDDEN, P],       # Layers_trunk
    ]

    key = jax.random.PRNGKey(0)
    k_x, k_p = jax.random.split(key)
    x = jax.random.normal(k_x, (B, N, 4), dtype=jnp.float32)
    params = init_deeponet_params(k_p, layers)

    # One-time packing (cached across calls), then the jitted forward.
    packed = pack_deeponet_params(params)
    fwd = jax.jit(deeponet_forward)
    out = jax.block_until_ready(fwd(x, packed))

    ref = deeponet_reference(x, params)
    assert out.shape == (B, N)
    assert jnp.allclose(out, ref, atol=1e-3, rtol=1e-3), (
        f"max abs err = {jnp.max(jnp.abs(out - ref))}")

    print("KERNEL_OK")
</pallas_src>

<mosaic_0001>
module attributes {stable_mosaic.version = 11 : i64} {
  func.func @_deeponet_kernel(%arg0: i32, %arg1: memref<16x128xbf16, #tpu.memory_space<vmem>>, %arg2: memref<128x128xbf16, #tpu.memory_space<vmem>>, %arg3: memref<3x128x128xbf16, #tpu.memory_space<vmem>>, %arg4: memref<16x128xf32, #tpu.memory_space<vmem>>) attributes {dimension_semantics = [#tpu.dimension_semantics<parallel>], iteration_bounds = array<i64: 1>, scalar_prefetch = 0 : i64, scratch_operands = 0 : i64, tpu.core_type = #tpu.core_type<tc>, window_params = [{transform_indices = @transform_0, window_bounds = array<i64: 16, 128>}, {pipeline_mode = #tpu.pipeline_mode<synchronous>, transform_indices = @transform_1, window_bounds = array<i64: 128, 128>}, {pipeline_mode = #tpu.pipeline_mode<synchronous>, transform_indices = @transform_2, window_bounds = array<i64: 3, 128, 128>}, {transform_indices = @transform_3, window_bounds = array<i64: 16, 128>}]} {
    %c0 = arith.constant 0 : index
    %c0_0 = arith.constant 0 : index
    %0 = vector.load %arg1[%c0, %c0_0] : memref<16x128xbf16, #tpu.memory_space<vmem>>, vector<16x128xbf16>
    %c0_1 = arith.constant 0 : index
    %c0_2 = arith.constant 0 : index
    %c0_3 = arith.constant 0 : index
    %1 = vector.load %arg3[%c0_1, %c0_2, %c0_3] : memref<3x128x128xbf16, #tpu.memory_space<vmem>>, vector<1x128x128xbf16>
    %2 = vector.shape_cast %1 : vector<1x128x128xbf16> to vector<128x128xbf16>
    %cst = arith.constant dense<0.000000e+00> : vector<16x128xf32>
    %3 = tpu.matmul %0, %2, %cst {dimension_numbers = #tpu.dot_dimension_numbers<[1], [0], [0], [1], [0, 0, 1, 1], [], []>} : vector<16x128xbf16>, vector<128x128xbf16>, vector<16x128xf32> -> vector<16x128xf32>
    %cst_4 = arith.constant 0.000000e+00 : f32
    %4 = vector.broadcast %cst_4 : f32 to vector<16x128xf32>
    %5 = arith.maximumf %3, %4 : vector<16x128xf32>
    %6 = arith.truncf %5 : vector<16x128xf32> to vector<16x128xbf16>
    %c1 = arith.constant 1 : index
    %c0_5 = arith.constant 0 : index
    %c0_6 = arith.constant 0 : index
    %7 = vector.load %arg3[%c1, %c0_5, %c0_6] : memref<3x128x128xbf16, #tpu.memory_space<vmem>>, vector<1x128x128xbf16>
    %8 = vector.shape_cast %7 : vector<1x128x128xbf16> to vector<128x128xbf16>
    %cst_7 = arith.constant dense<0.000000e+00> : vector<16x128xf32>
    %9 = tpu.matmul %6, %8, %cst_7 {dimension_numbers = #tpu.dot_dimension_numbers<[1], [0], [0], [1], [0, 0, 1, 1], [], []>} : vector<16x128xbf16>, vector<128x128xbf16>, vector<16x128xf32> -> vector<16x128xf32>
    %cst_8 = arith.constant 0.000000e+00 : f32
    %10 = vector.broadcast %cst_8 : f32 to vector<16x128xf32>
    %11 = arith.maximumf %9, %10 : vector<16x128xf32>
    %12 = arith.truncf %11 : vector<16x128xf32> to vector<16x128xbf16>
    %c2 = arith.constant 2 : index
    %c0_9 = arith.constant 0 : index
    %c0_10 = arith.constant 0 : index
    %13 = vector.load %arg3[%c2, %c0_9, %c0_10] : memref<3x128x128xbf16, #tpu.memory_space<vmem>>, vector<1x128x128xbf16>
    %14 = vector.shape_cast %13 : vector<1x128x128xbf16> to vector<128x128xbf16>
    %cst_11 = arith.constant dense<0.000000e+00> : vector<16x128xf32>
    %15 = tpu.matmul %12, %14, %cst_11 {dimension_numbers = #tpu.dot_dimension_numbers<[1], [0], [0], [1], [0, 0, 1, 1], [], []>} : vector<16x128xbf16>, vector<128x128xbf16>, vector<16x128xf32> -> vector<16x128xf32>
    %c64_i32 = arith.constant 64 : i32
    %16 = tpu.dynamic_rotate %15 by %c64_i32 dim 1 : vector<16x128xf32>, i32 -> vector<16x128xf32>
    %17 = arith.mulf %15, %16 : vector<16x128xf32>
    %18 = arith.truncf %17 : vector<16x128xf32> to vector<16x128xbf16>
    %c0_12 = arith.constant 0 : index
    %c0_13 = arith.constant 0 : index
    %19 = vector.load %arg2[%c0_12, %c0_13] : memref<128x128xbf16, #tpu.memory_space<vmem>>, vector<128x128xbf16>
    %cst_14 = arith.constant dense<0.000000e+00> : vector<16x128xf32>
    %20 = tpu.matmul %18, %19, %cst_14 {dimension_numbers = #tpu.dot_dimension_numbers<[1], [0], [0], [1], [0, 0, 1, 1], [], []>} : vector<16x128xbf16>, vector<128x128xbf16>, vector<16x128xf32> -> vector<16x128xf32>
    %c0_15 = arith.constant 0 : index
    %c0_16 = arith.constant 0 : index
    %21 = vector.load %arg4[%c0_15, %c0_16] : memref<16x128xf32, #tpu.memory_space<vmem>>, vector<16x128xf32>
    tpu.vector_store %arg4[%c0_15, %c0_16], %20 {strides = array<i32>} : memref<16x128xf32, #tpu.memory_space<vmem>>, vector<16x128xf32>,
    return
  }
  func.func @transform_0(%arg0: i32) -> (i32, i32) {
    %c0_i32 = arith.constant 0 : i32
    %c0_i32_0 = arith.constant 0 : i32
    return %arg0, %c0_i32 : i32, i32
  }
  func.func @transform_1(%arg0: i32) -> (i32, i32) {
    %c0_i32 = arith.constant 0 : i32
    %c0_i32_0 = arith.constant 0 : i32
    %c0_i32_1 = arith.constant 0 : i32
    return %c0_i32, %c0_i32_0 : i32, i32
  }
  func.func @transform_2(%arg0: i32) -> (i32, i32, i32) {
    %c0_i32 = arith.constant 0 : i32
    %c0_i32_0 = arith.constant 0 : i32
    %c0_i32_1 = arith.constant 0 : i32
    %c0_i32_2 = arith.constant 0 : i32
    return %c0_i32, %c0_i32_0, %c0_i32_1 : i32, i32, i32
  }
  func.func @transform_3(%arg0: i32) -> (i32, i32) {
    %c0_i32 = arith.constant 0 : i32
    %c0_i32_0 = arith.constant 0 : i32
    return %arg0, %c0_i32 : i32, i32
  }
}

</mosaic_0001>

<bundles_post_ra>
// kernel: deeponet_forward.1
= control target key start
LH: loop header
LB: loop body
LE: loop exit
PB: predicated region body
PF: predicated region fallthrough
CT: control target
= control target key end

     0   :  { %8 = vsyncpa [#allocation3], 0  ;;  %s566_s15 = smov [#allocation2]   ;;  %s567_s17 = smov 64   ;;  %s629_s0 = inlined_call_operand.vmem [shape: bf16[16,128], index: 0, kind: input, shape index: {}]   ;;  %s630_s1 = inlined_call_operand.vmem [shape: bf16[128,128], index: 1, kind: input, shape index: {}]   ;;  %s631_s2 = inlined_call_operand.hbm [shape: bf16[3,128,128], index: 2, kind: input, shape index: {}]   ;;  %s632_s3 = inlined_call_operand.vmem [shape: f32[16,128], index: 3, kind: output, shape index: {}]  }
   0x1   :  { %s17_s14 = sshll.u32 %s631_s2, 4  ;;  %s19_s16 = sshll.u32 %s566_s15, 4  ;;  %s18_s14 = int_to_ptr.hbm [resolvable:$true] %s17_s14  ;;  %s20_s16 = int_to_ptr.vmem [resolvable:$true] %s19_s16 }
   0x2   :  { %s568_s18 = smov 4  }
   0x3   :  { %25 = dma.hbm_to_vmem [thread:$0]  %s18_s14, 3072, %s20_s16, [#allocation3], %s567_s17, %s567_s17, %s568_s18  }
   0x4   :  { %564 = dma.done.wait [#allocation3], 3072  }
   0x5   :  { %565 = vsyncadd [#allocation3], 4294964224  ;;  %v512_v0 = vld [vmem:[#allocation2 + $0x38] sm:$0xff]  ;;  %v511_v1 = vld [vmem:[#allocation2 + $0x30] sm:$0xff] }
   0x6   :  { %102 = vmatpush.bf16.msra.mxu0 %v512_v0  ;;  %v520_v2 = vld [vmem:[#allocation2 + $0x78] sm:$0xff]  ;;  %v519_v3 = vld [vmem:[#allocation2 + $0x70] sm:$0xff]  ;;  %v510_v4 = vld [vmem:[#allocation2 + $0x28] sm:$0xff] }
   0x7   :  { %184 = vmatpush.bf16.msra.mxu1 %v520_v2  ;;  %v518_v5 = vld [vmem:[#allocation2 + $0x68] sm:$0xff]  ;;  %v509_v6 = vld [vmem:[#allocation2 + $0x20] sm:$0xff]  ;;  %v508_v8 = vld [vmem:[#allocation2 + $0x18] sm:$0xff] }
   0x8   :  { %v517_v7 = vld [vmem:[#allocation2 + $0x60] sm:$0xff]  ;;  %v516_v9 = vld [vmem:[#allocation2 + $0x58] sm:$0xff]  ;;  %v507_v10 = vld [vmem:[#allocation2 + $0x10] sm:$0xff] }
   0x9   :  { %v506_v11 = vld [vmem:[#allocation2 + $0x8] sm:$0xff]  ;;  %v505_v12 = vld [vmem:[#allocation2] sm:$0xff]  ;;  %v515_v14 = vld [vmem:[#allocation2 + $0x50] sm:$0xff] }
   0xa   :  { %103 = vmatpush.bf16.msra.mxu0 %v511_v1  ;;  %v504_v13 = vld [vmem:[%s629_s0] sm:$0xff]  ;;  %v514_v15 = vld [vmem:[#allocation2 + $0x48] sm:$0xff]  ;;  %v528_v17 = vld [vmem:[#allocation2 + $0xb8] sm:$0xff] }
   0xb   :  { %185 = vmatpush.bf16.msra.mxu1 %v519_v3  ;;  %v513_v16 = vld [vmem:[#allocation2 + $0x40] sm:$0xff]  ;;  %266 = vmatpush.bf16.msra.mxu2 %v528_v17  ;;  %v527_v18 = vld [vmem:[#allocation2 + $0xb0] sm:$0xff]  ;;  %v526_v19 = vld [vmem:[#allocation2 + $0xa8] sm:$0xff] }
   0xc   :  { %v525_v20 = vld [vmem:[#allocation2 + $0xa0] sm:$0xff]  ;;  %v524_v21 = vld [vmem:[#allocation2 + $0x98] sm:$0xff]  ;;  %v523_v27 = vld [vmem:[#allocation2 + $0x90] sm:$0xff] }
   0xd   :  { %v522_v28 = vld [vmem:[#allocation2 + $0x88] sm:$0xff]  ;;  %v521_v29 = vld [vmem:[#allocation2 + $0x80] sm:$0xff]  ;;  %v536_v35 = vld [vmem:[%s630_s1 + $0x38] sm:$0xff] }
   0xe   :  { %104 = vmatpush.bf16.msra.mxu0 %v510_v4  ;;  %351 = vmatpush.bf16.msra.mxu3 %v536_v35  ;;  %v535_v36 = vld [vmem:[%s630_s1 + $0x30] sm:$0xff]  ;;  %v534_v37 = vld [vmem:[%s630_s1 + $0x28] sm:$0xff]  ;;  %v533_v38 = vld [vmem:[%s630_s1 + $0x20] sm:$0xff] }
   0xf   :  { %186 = vmatpush.bf16.msra.mxu1 %v518_v5  ;;  %267 = vmatpush.bf16.msra.mxu2 %v527_v18  ;;  %v532_v39 = vld [vmem:[%s630_s1 + $0x18] sm:$0xff]  ;;  %v531_v42 = vld [vmem:[%s630_s1 + $0x10] sm:$0xff]  ;;  %v530_v43 = vld [vmem:[%s630_s1 + $0x8] sm:$0xff] }
  0x10   :  { %v529_v44 = vld [vmem:[%s630_s1] sm:$0xff] }
  0x12   :  { %105 = vmatpush.bf16.msra.mxu0 %v509_v6  ;;  %352 = vmatpush.bf16.msra.mxu3 %v535_v36 }
  0x13   :  { %187 = vmatpush.bf16.msra.mxu1 %v517_v7  ;;  %268 = vmatpush.bf16.msra.mxu2 %v526_v19 }
  0x16   :  { %106 = vmatpush.bf16.msra.mxu0 %v508_v8  ;;  %353 = vmatpush.bf16.msra.mxu3 %v534_v37 }
  0x17   :  { %188 = vmatpush.bf16.msra.mxu1 %v516_v9  ;;  %269 = vmatpush.bf16.msra.mxu2 %v525_v20 }
  0x1a   :  { %107 = vmatpush.bf16.msra.mxu0 %v507_v10  ;;  %354 = vmatpush.bf16.msra.mxu3 %v533_v38 }
  0x1b   :  { %189 = vmatpush.bf16.msra.mxu1 %v515_v14  ;;  %270 = vmatpush.bf16.msra.mxu2 %v524_v21 }
  0x1e   :  { %108 = vmatpush.bf16.msra.mxu0 %v506_v11  ;;  %355 = vmatpush.bf16.msra.mxu3 %v532_v39 }
  0x1f   :  { %190 = vmatpush.bf16.msra.mxu1 %v514_v15  ;;  %271 = vmatpush.bf16.msra.mxu2 %v523_v27 }
  0x22   :  { %109 = vmatpush.bf16.msra.mxu0 %v505_v12  ;;  %356 = vmatpush.bf16.msra.mxu3 %v531_v42 }
  0x23   :  { %191 = vmatpush.bf16.msra.mxu1 %v513_v16  ;;  %272 = vmatpush.bf16.msra.mxu2 %v522_v28 }
  0x25   :  { %110 = vmatmul.bf16.vlgmr.msra.gmra.mxu0 %v504_v13 }
  0x26   :  { %357 = vmatpush.bf16.msra.mxu3 %v530_v43 }
  0x27   :  { %273 = vmatpush.bf16.msra.mxu2 %v521_v29 }
  0x2a   :  { %358 = vmatpush.bf16.msra.mxu3 %v529_v44 }
  0xa2   :  { %v111_v22 = vpop.f32.mrf.mxu0 }
  0xa3   :  { %v116_v24 = vmax.f32 %v111_v22, 0.0 }
  0xaa   :  { %v113_v23 = vpop.f32.mrf.mxu0 }
  0xab   :  { %v117_v25 = vmax.f32 %v113_v23, 0.0 }
  0xad   :  { %v118_v26 = vpack.c.bf16 %v117_v25, %v116_v24 }
  0xaf   :  { %192 = vmatmul.bf16.vlgmr.msra.gmra.mxu1 %v118_v26 }
 0x12c   :  { %v193_v30 = vpop.f32.mrf.mxu1 }
 0x12d   :  { %v198_v32 = vmax.f32 %v193_v30, 0.0 }
 0x134   :  { %v195_v31 = vpop.f32.mrf.mxu1 }
 0x135   :  { %v199_v33 = vmax.f32 %v195_v31, 0.0 }
 0x137   :  { %v200_v34 = vpack.c.bf16 %v199_v33, %v198_v32 }
 0x139   :  { %274 = vmatmul.bf16.vlgmr.msra.gmra.mxu2 %v200_v34 }
 0x1bc   :  { %v275_v40 = vpop.f32.mrf.mxu2 }
 0x1bd   :  { %280 = vrot.lane.b32.xlu0 %v275_v40, %s567_s17 }
 0x1c4   :  { %v277_v41 = vpop.f32.mrf.mxu2 }
 0x1c5   :  { %282 = vrot.lane.b32.xlu0 %v277_v41, %s567_s17 }
 0x22f   :  { %v281_v45 = vpop.permute.xlu0 %280 }
 0x230   :  { %v284_v47 = vmul.f32 %v281_v45, %v275_v40 }
 0x237   :  { %v283_v46 = vpop.permute.xlu0 %282 }
 0x238   :  { %v285_v48 = vmul.f32 %v283_v46, %v277_v41 }
 0x23a   :  { %v286_v49 = vpack.c.bf16 %v285_v48, %v284_v47 }
 0x23c   :  { %359 = vmatmul.bf16.vlgmr.msra.gmra.mxu3 %v286_v49 }
 0x2bf   :  { %v360_v50 = vpop.f32.mrf.mxu3 }
 0x2c0   :  { %365 = vst [vmem:[%s632_s3] sm:$0xff] %v360_v50 }
 0x2c7   :  { %v362_v51 = vpop.f32.mrf.mxu3 }
 0x2c8   :  { %366 = vst [vmem:[%s632_s3 + $0x8] sm:$0xff] %v362_v51 }
 0x2c9   :  { %371 = vsyncpa [#allocation3], 1 }

</bundles_post_ra>
